<compile_context>
chip_gen: v5e
topology: v5e:2x2
jax: 0.10.0
libtpu: 0.0.40
codegen_flags: <defaults>
</compile_context>

<pallas_src>
import functools
import numpy as np
import jax
import jax.numpy as jnp
from jax.experimental import pallas as pl
from jax.experimental.pallas import tpu as pltpu

_ACT_DTYPE = jnp.bfloat16          # activation / matmul-operand dtype (f32 accumulate)


def _round_up(x, m):
    return ((x + m - 1) // m) * m


def _vmem_budget():
    """Generation-aware VMEM budget: ~3/4 of physical VMEM, capped at 100 MiB
    (v5e/v6e 128 MiB -> ~96 MiB; v7x 64 MiB -> 48 MiB; fallback conservative)."""
    cap = 64 * 1024 * 1024
    try:
        info = pltpu.get_tpu_info()
        cap = int(getattr(info, "vmem_capacity_bytes", cap))
    except Exception:
        pass
    return max(32 * 1024 * 1024, min(cap * 3 // 4, 100 * 1024 * 1024))


_VMEM_LIMIT = _vmem_budget()


# ---------------------------------------------------------------------------
# Kernel 1: K-tiled matmul + epilogue (1x1 convs and strided-conv im2col path)
#   out = [relu]( patches @ w + shift )
# ---------------------------------------------------------------------------

def _mm_kernel(p_ref, w_ref, shift_ref, o_ref, acc_ref, *, relu):
    @pl.when(pl.program_id(2) == 0)
    def _():
        acc_ref[...] = jnp.zeros_like(acc_ref)

    acc_ref[...] += jnp.dot(p_ref[...], w_ref[...],
                            preferred_element_type=jnp.float32)

    @pl.when(pl.program_id(2) == pl.num_programs(2) - 1)
    def _():
        acc = acc_ref[...] + shift_ref[...]
        if relu:
            acc = jnp.maximum(acc, 0.0)
        o_ref[...] = acc.astype(o_ref.dtype)


def _pick_tk(kp):
    """kp is already a multiple of 128.  Use a single K step when it fits."""
    if kp <= 2304:
        return kp
    for t in range(2048, 127, -128):
        if kp % t == 0:
            return t
    return 128


def _matmul_epilogue(lhs, wmat, shift, *, relu, cout):
    """out[:M, :cout] = [relu](lhs @ wmat + shift).  wmat/shift are pre-padded
    (Kp, Coutp) / (Coutp,) bf16/f32 arrays produced by fold_params()."""
    M, K = lhs.shape
    Kp, Coutp = wmat.shape

    TM = min(512, _round_up(M, 8))
    Mp = _round_up(M, TM)
    TN = 256 if Coutp % 256 == 0 else 128
    TK = _pick_tk(Kp)

    p = lhs.astype(_ACT_DTYPE)
    if Kp != K:
        p = jnp.pad(p, ((0, 0), (0, Kp - K)))
    if Mp != M:
        p = jnp.pad(p, ((0, Mp - M), (0, 0)))

    out = pl.pallas_call(
        functools.partial(_mm_kernel, relu=relu),
        out_shape=jax.ShapeDtypeStruct((Mp, Coutp), _ACT_DTYPE),
        grid=(Mp // TM, Coutp // TN, Kp // TK),
        in_specs=[
            pl.BlockSpec((TM, TK), lambda i, j, k: (i, k)),
            pl.BlockSpec((TK, TN), lambda i, j, k: (k, j)),
            pl.BlockSpec((1, TN), lambda i, j, k: (0, j)),
        ],
        out_specs=pl.BlockSpec((TM, TN), lambda i, j, k: (i, j)),
        scratch_shapes=[pltpu.VMEM((TM, TN), jnp.float32)],
        compiler_params=pltpu.CompilerParams(
            dimension_semantics=("parallel", "parallel", "arbitrary"),
            vmem_limit_bytes=_VMEM_LIMIT,
        ),
    )(p, wmat, shift.reshape(1, Coutp))

    if Mp != M or cout != Coutp:
        out = out[:M, :cout]
    return out


# ---------------------------------------------------------------------------
# Kernel 2: fused stride-1 KxK conv.  Input is the KH row-shifted padded copies
# concatenated on the channel axis -> each column tap dx is ONE matmul with
# K = KH*Cin; the dx shift is a pltpu.roll of the f32 result (the wrapped tail
# lands in flat columns >= Wo, which are sliced away).  BN scale is folded into
# the weights; epilogue adds shift [+ residual] and applies ReLU.
# ---------------------------------------------------------------------------

def _conv_s1_kernel(xs_ref, w_ref, shift_ref, o_ref, *, kw, tr, wpa, wo, relu):
    lhs = xs_ref[...]                                     # (L, KH*Cin) bf16
    L = tr * wpa
    acc = jnp.dot(lhs, w_ref[0], preferred_element_type=jnp.float32)
    for dx in range(1, kw):
        z = jnp.dot(lhs, w_ref[dx], preferred_element_type=jnp.float32)
        acc = acc + pltpu.roll(z, shift=L - dx, axis=0)   # == roll by -dx
    acc = acc + shift_ref[...]                            # (L, TN) + (1, TN)
    out = acc.reshape(tr, wpa, o_ref.shape[2])[:, 0:wo, :]
    if relu:
        out = jnp.maximum(out, 0.0)
    o_ref[...] = out.astype(o_ref.dtype)


def _conv_s1_res_kernel(xs_ref, w_ref, shift_ref, r_ref, o_ref,
                        *, kw, tr, wpa, wo, relu):
    lhs = xs_ref[...]
    L = tr * wpa
    acc = jnp.dot(lhs, w_ref[0], preferred_element_type=jnp.float32)
    for dx in range(1, kw):
        z = jnp.dot(lhs, w_ref[dx], preferred_element_type=jnp.float32)
        acc = acc + pltpu.roll(z, shift=L - dx, axis=0)
    acc = acc + shift_ref[...]
    out = (acc.reshape(tr, wpa, o_ref.shape[2])[:, 0:wo, :]
           + r_ref[...].astype(jnp.float32))
    if relu:
        out = jnp.maximum(out, 0.0)
    o_ref[...] = out.astype(o_ref.dtype)


def _pick_tr(nr, wpa, kcat):
    """Row tile: fit the VMEM budget, keep ~4+ row steps when possible."""
    in_cap = _VMEM_LIMIT // 10      # bf16 input block (double-buffered)
    acc_cap = _VMEM_LIMIT // 10     # f32 accumulator values
    tr = min(nr,
             max(1, in_cap // (wpa * kcat * 2)),
             max(1, acc_cap // (wpa * 128 * 4)))
    if nr >= 8:
        tr = min(tr, max(1, nr // 4))
    return max(1, tr)


def _conv_s1_fused(x, wcat, shift, *, kh, kw, pad, cout, residual=None,
                   relu=True):
    """Stride-1 KxK conv on NHWC bf16 activations via the fused tap kernel.
    wcat: (KW, KH*Cin, Coutp) bf16 (pre-folded/padded); shift: (Coutp,) f32."""
    N, H, W, Cin = x.shape
    Kcat = kh * Cin
    KW, Kc_w, Coutp = wcat.shape
    assert KW == kw and Kc_w == Kcat and shift.shape[0] == Coutp
    Ho = H + 2 * pad - kh + 1
    Wo = W + 2 * pad - kw + 1
    Wp = W + 2 * pad
    Wpa = _round_up(Wp, 8)
    # roll-wrap invariant: contaminated flat positions must land in cols >= Wo
    assert Wpa >= Wo + kw - 1

    xpad = jnp.pad(x.astype(_ACT_DTYPE),
                   ((0, 0), (pad, pad), (pad, pad + Wpa - Wp), (0, 0)))
    # KH row-shifted copies concatenated on the channel axis (dy-major) so that
    # each column tap is a single K = KH*Cin matmul.
    xs = jnp.concatenate([xpad[:, dy:dy + Ho, :, :] for dy in range(kh)],
                         axis=-1)                       # (N, Ho, Wpa, KH*Cin)

    NR = N * Ho
    TR = _pick_tr(NR, Wpa, Kcat)
    NRp = _round_up(NR, TR)                             # handles awkward NR
    n_row_steps = NRp // TR
    TN = 256 if (Coutp % 256 == 0 and n_row_steps >= 4) else 128
    L = TR * Wpa

    xs = xs.reshape(NR * Wpa, Kcat)
    if NRp != NR:
        xs = jnp.pad(xs, ((0, (NRp - NR) * Wpa), (0, 0)))

    in_specs = [
        pl.BlockSpec((L, Kcat), lambda i, j: (i, 0)),
        pl.BlockSpec((kw, Kcat, TN), lambda i, j: (0, 0, j)),
        pl.BlockSpec((1, TN), lambda i, j: (0, j)),
    ]
    args = [xs, wcat, shift.reshape(1, Coutp)]
    common = dict(kw=kw, tr=TR, wpa=Wpa, wo=Wo, relu=relu)
    if residual is not None:
        Cres = residual.shape[-1]
        r = residual.astype(_ACT_DTYPE).reshape(NR, Wo, Cres)
        if NRp != NR or Coutp != Cres:
            r = jnp.pad(r, ((0, NRp - NR), (0, 0), (0, Coutp - Cres)))
        in_specs.append(pl.BlockSpec((TR, Wo, TN), lambda i, j: (i, 0, j)))
        args.append(r)
        kernel = functools.partial(_conv_s1_res_kernel, **common)
    else:
        kernel = functools.partial(_conv_s1_kernel, **common)

    out = pl.pallas_call(
        kernel,
        out_shape=jax.ShapeDtypeStruct((NRp, Wo, Coutp), _ACT_DTYPE),
        grid=(NRp // TR, Coutp // TN),
        in_specs=in_specs,
        out_specs=pl.BlockSpec((TR, Wo, TN), lambda i, j: (i, 0, j)),
        compiler_params=pltpu.CompilerParams(
            dimension_semantics=("parallel", "parallel"),
            vmem_limit_bytes=_VMEM_LIMIT,
        ),
    )(*args)

    out = out[:NR].reshape(N, Ho, Wo, Coutp)
    if cout != Coutp:
        out = out[..., :cout]
    return out


# ------------------------------ conv wrappers ---------------------------------

def _im2col(x, kh, kw, stride, pad):
    if pad:
        x = jnp.pad(x, ((0, 0), (pad, pad), (pad, pad), (0, 0)))
    N, H, W, C = x.shape
    Ho = (H - kh) // stride + 1
    Wo = (W - kw) // stride + 1
    cols = []
    for i in range(kh):
        for j in range(kw):
            cols.append(
                x[:, i:i + stride * (Ho - 1) + 1:stride,
                     j:j + stride * (Wo - 1) + 1:stride, :])
    patches = jnp.concatenate(cols, axis=-1)  # (N, Ho, Wo, kh*kw*C)
    return patches.reshape(N * Ho * Wo, kh * kw * C), N, Ho, Wo


def _apply_s1(fp, x, *, cout, relu=True, residual=None, kh=3, kw=3, pad=1):
    return _conv_s1_fused(x, fp['w'], fp['shift'], kh=kh, kw=kw, pad=pad,
                          cout=cout, residual=residual, relu=relu)


def _apply_mm(fp, x, *, cout, stride=1, relu=True):
    if stride > 1:
        x = x[:, ::stride, ::stride, :]
    N, H, W, Cin = x.shape
    out = _matmul_epilogue(x.reshape(N * H * W, Cin), fp['w'], fp['shift'],
                           relu=relu, cout=cout)
    return out.reshape(N, H, W, cout)


def _apply_im2col(fp, x, *, kh, kw, stride, pad, cout, relu=True):
    patches, N, Ho, Wo = _im2col(x, kh, kw, stride, pad)
    out = _matmul_epilogue(patches, fp['w'], fp['shift'], relu=relu, cout=cout)
    return out.reshape(N, Ho, Wo, cout)


# ----------------------- non-conv glue (plain JAX) ---------------------------

def maxpool_3x3_s2(x):
    """MaxPool2d(kernel=3, stride=2, padding=1), NHWC."""
    x = jnp.pad(x, ((0, 0), (1, 1), (1, 1), (0, 0)), constant_values=-jnp.inf)
    N, H, W, C = x.shape
    Ho = (H - 3) // 2 + 1
    Wo = (W - 3) // 2 + 1
    out = None
    for i in range(3):
        for j in range(3):
            s = x[:, i:i + 2 * (Ho - 1) + 1:2, j:j + 2 * (Wo - 1) + 1:2, :]
            out = s if out is None else jnp.maximum(out, s)
    return out


def upsample2x_bilinear(x):
    """nn.Upsample(scale_factor=2, mode='bilinear', align_corners=True), NHWC."""
    dt = x.dtype
    xf = x.astype(jnp.float32)
    N, H, W, C = xf.shape
    Ho, Wo = 2 * H, 2 * W

    def grid(n_in, n_out):
        if n_in == 1:
            src = jnp.zeros((n_out,), jnp.float32)
        else:
            src = jnp.arange(n_out, dtype=jnp.float32) * (n_in - 1) / (n_out - 1)
        i0 = jnp.floor(src).astype(jnp.int32)
        i1 = jnp.minimum(i0 + 1, n_in - 1)
        frac = src - i0.astype(jnp.float32)
        return i0, i1, frac

    y0, y1, fy = grid(H, Ho)
    x0, x1, fx = grid(W, Wo)
    r0 = jnp.take(xf, y0, axis=1)
    r1 = jnp.take(xf, y1, axis=1)
    r = r0 * (1.0 - fy)[None, :, None, None] + r1 * fy[None, :, None, None]
    c0 = jnp.take(r, x0, axis=2)
    c1 = jnp.take(r, x1, axis=2)
    out = c0 * (1.0 - fx)[None, None, :, None] + c1 * fx[None, None, :, None]
    return out.astype(dt)


# --------------------------- parameter preparation ----------------------------
# Raw (torch-like) params -> kernel-ready bf16 weights with BN folded, done ONCE
# outside the jitted forward.

def _fold_bn(w, bias, bn, eps=1e-5):
    Cout = w.shape[-1]
    if bias is None:
        bias = jnp.zeros((Cout,), jnp.float32)
    if bn is None:
        return w, bias
    gamma, beta, mean, var = bn
    scale = gamma / jnp.sqrt(var + eps)
    return w * scale[None, None, None, :], beta + (bias - mean) * scale


def _prep_s1(w, bias, bn):
    """Stride-1 KxK conv: (KW, KH*Cin, Coutp) bf16 per-tap weights."""
    w, shift = _fold_bn(w, bias, bn)
    KH, KW, Cin, Cout = w.shape
    Coutp = _round_up(Cout, 128)
    w = jnp.pad(w, ((0, 0), (0, 0), (0, 0), (0, Coutp - Cout)))
    shift = jnp.pad(shift, (0, Coutp - Cout))
    wcat = jnp.transpose(w, (1, 0, 2, 3)).reshape(KW, KH * Cin, Coutp)
    return {'w': wcat.astype(_ACT_DTYPE), 'shift': shift.astype(jnp.float32)}


def _prep_mm(w, bias, bn):
    """1x1 conv: (Kp, Coutp) bf16 matmul weights."""
    w, shift = _fold_bn(w, bias, bn)
    Cin, Cout = w.shape[2], w.shape[3]
    Kp = _round_up(Cin, 128)
    Coutp = _round_up(Cout, 128)
    wmat = jnp.pad(w.reshape(Cin, Cout), ((0, Kp - Cin), (0, Coutp - Cout)))
    shift = jnp.pad(shift, (0, Coutp - Cout))
    return {'w': wmat.astype(_ACT_DTYPE), 'shift': shift.astype(jnp.float32)}


def _prep_im2col(w, bias, bn):
    """Strided / tiny-Cin KxK conv: (Kp, Coutp) bf16 im2col weights."""
    w, shift = _fold_bn(w, bias, bn)
    KH, KW, Cin, Cout = w.shape
    K = KH * KW * Cin
    Kp = _round_up(K, 128)
    Coutp = _round_up(Cout, 128)
    wmat = jnp.pad(w.reshape(K, Cout), ((0, Kp - K), (0, Coutp - Cout)))
    shift = jnp.pad(shift, (0, Coutp - Cout))
    return {'w': wmat.astype(_ACT_DTYPE), 'shift': shift.astype(jnp.float32)}


def fold_params(P):
    def cr(p):
        return p['w'], p['b'], p['bn']

    def prep_block(bp, stride):
        d = {
            'conv1': (_prep_s1 if stride == 1 else _prep_im2col)(
                bp['conv1']['w'], None, bp['bn1']),
            'conv2': _prep_s1(bp['conv2']['w'], None, bp['bn2']),
        }
        if 'down' in bp:
            d['down'] = _prep_mm(bp['down']['w'], None, bp['bn_down'])
        return d

    FP = {}
    FP['conv1'] = _prep_im2col(P['conv1']['w'], None, P['bn1'])
    FP['layer1'] = [prep_block(b, 1) for b in P['layer1']]
    FP['layer2'] = [prep_block(P['layer2'][0], 2), prep_block(P['layer2'][1], 1)]
    FP['layer3'] = [prep_block(P['layer3'][0], 2), prep_block(P['layer3'][1], 1)]
    FP['layer4'] = [prep_block(P['layer4'][0], 2), prep_block(P['layer4'][1], 1)]
    for name in ['layer0_1x1', 'layer1_1x1', 'layer2_1x1', 'layer3_1x1',
                 'layer4_1x1']:
        FP[name] = _prep_mm(*cr(P[name]))
    for name in ['conv_up3', 'conv_up2', 'conv_up1', 'conv_up0',
                 'conv_original_size1', 'conv_original_size2']:
        FP[name] = _prep_s1(*cr(P[name]))
    FP['conv_original_size0'] = _prep_im2col(*cr(P['conv_original_size0']))
    FP['conv_last'] = _prep_mm(P['conv_last']['w'], P['conv_last']['b'], None)
    return FP


# ------------------------------- raw parameters -------------------------------

def _init_conv(key, kh, kw, cin, cout, use_bias):
    k1, k2 = jax.random.split(key)
    fan_in = kh * kw * cin
    w = jax.random.normal(k1, (kh, kw, cin, cout), jnp.float32) / np.sqrt(fan_in)
    b = 0.01 * jax.random.normal(k2, (cout,), jnp.float32) if use_bias else None
    return {'w': w, 'b': b}


def _init_bn(key, c):
    k1, k2, k3, k4 = jax.random.split(key, 4)
    gamma = 1.0 + 0.1 * jax.random.normal(k1, (c,), jnp.float32)
    beta = 0.1 * jax.random.normal(k2, (c,), jnp.float32)
    mean = 0.1 * jax.random.normal(k3, (c,), jnp.float32)
    var = 1.0 + 0.5 * jax.random.uniform(k4, (c,), jnp.float32)
    return (gamma, beta, mean, var)


def _init_convrelu(key, cin, cout, k):
    k1, k2 = jax.random.split(key)
    p = _init_conv(k1, k, k, cin, cout, True)
    p['bn'] = _init_bn(k2, cout)
    return p


def _init_basic_block(key, cin, cout, stride):
    ks = jax.random.split(key, 6)
    p = {
        'conv1': _init_conv(ks[0], 3, 3, cin, cout, False),
        'bn1': _init_bn(ks[1], cout),
        'conv2': _init_conv(ks[2], 3, 3, cout, cout, False),
        'bn2': _init_bn(ks[3], cout),
    }
    if stride != 1 or cin != cout:
        p['down'] = _init_conv(ks[4], 1, 1, cin, cout, False)
        p['bn_down'] = _init_bn(ks[5], cout)
    return p


def init_params(key):
    ks = iter(jax.random.split(key, 32))
    P = {}
    # ResNet18 encoder
    P['conv1'] = _init_conv(next(ks), 7, 7, 3, 64, False)
    P['bn1'] = _init_bn(next(ks), 64)
    P['layer1'] = [_init_basic_block(next(ks), 64, 64, 1),
                   _init_basic_block(next(ks), 64, 64, 1)]
    P['layer2'] = [_init_basic_block(next(ks), 64, 128, 2),
                   _init_basic_block(next(ks), 128, 128, 1)]
    P['layer3'] = [_init_basic_block(next(ks), 128, 256, 2),
                   _init_basic_block(next(ks), 256, 256, 1)]
    P['layer4'] = [_init_basic_block(next(ks), 256, 512, 2),
                   _init_basic_block(next(ks), 512, 512, 1)]
    # U-Net decoder
    P['layer0_1x1'] = _init_convrelu(next(ks), 64, 64, 1)
    P['layer1_1x1'] = _init_convrelu(next(ks), 64, 64, 1)
    P['layer2_1x1'] = _init_convrelu(next(ks), 128, 128, 1)
    P['layer3_1x1'] = _init_convrelu(next(ks), 256, 256, 1)
    P['layer4_1x1'] = _init_convrelu(next(ks), 512, 512, 1)
    P['conv_up3'] = _init_convrelu(next(ks), 256 + 512, 512, 3)
    P['conv_up2'] = _init_convrelu(next(ks), 128 + 512, 256, 3)
    P['conv_up1'] = _init_convrelu(next(ks), 64 + 256, 256, 3)
    P['conv_up0'] = _init_convrelu(next(ks), 64 + 256, 128, 3)
    P['conv_original_size0'] = _init_convrelu(next(ks), 3, 64, 3)
    P['conv_original_size1'] = _init_convrelu(next(ks), 64, 64, 3)
    P['conv_original_size2'] = _init_convrelu(next(ks), 64 + 128, 64, 3)
    P['conv_last'] = _init_conv(next(ks), 1, 1, 64, 1, True)
    return P


# ------------------------------- forward pass ---------------------------------

def _basic_block(fp, x, *, stride, cout):
    if stride == 1:
        out = _apply_s1(fp['conv1'], x, cout=cout, relu=True)
    else:
        out = _apply_im2col(fp['conv1'], x, kh=3, kw=3, stride=stride, pad=1,
                            cout=cout, relu=True)
    if 'down' in fp:
        identity = _apply_mm(fp['down'], x, cout=cout, stride=stride, relu=False)
    else:
        identity = x
    return _apply_s1(fp['conv2'], out, cout=cout, relu=True, residual=identity)


def resnet_unet_forward(FP, x_nchw):
    x = jnp.transpose(x_nchw, (0, 2, 3, 1)).astype(_ACT_DTYPE)  # -> NHWC bf16

    x_original = _apply_im2col(FP['conv_original_size0'], x,
                               kh=3, kw=3, stride=1, pad=1, cout=64)
    x_original = _apply_s1(FP['conv_original_size1'], x_original, cout=64)

    # layer0 = conv1 + bn1 + relu (7x7, stride 2, pad 3)
    layer0 = _apply_im2col(FP['conv1'], x, kh=7, kw=7, stride=2, pad=3, cout=64)

    # layer1 = maxpool + resnet layer1
    l = maxpool_3x3_s2(layer0)
    l = _basic_block(FP['layer1'][0], l, stride=1, cout=64)
    layer1 = _basic_block(FP['layer1'][1], l, stride=1, cout=64)
    l = _basic_block(FP['layer2'][0], layer1, stride=2, cout=128)
    layer2 = _basic_block(FP['layer2'][1], l, stride=1, cout=128)
    l = _basic_block(FP['layer3'][0], layer2, stride=2, cout=256)
    layer3 = _basic_block(FP['layer3'][1], l, stride=1, cout=256)
    l = _basic_block(FP['layer4'][0], layer3, stride=2, cout=512)
    layer4 = _basic_block(FP['layer4'][1], l, stride=1, cout=512)

    layer4 = _apply_mm(FP['layer4_1x1'], layer4, cout=512)
    u = upsample2x_bilinear(layer4)
    layer3 = _apply_mm(FP['layer3_1x1'], layer3, cout=256)
    u = jnp.concatenate([u, layer3], axis=-1)
    u = _apply_s1(FP['conv_up3'], u, cout=512)

    u = upsample2x_bilinear(u)
    layer2 = _apply_mm(FP['layer2_1x1'], layer2, cout=128)
    u = jnp.concatenate([u, layer2], axis=-1)
    u = _apply_s1(FP['conv_up2'], u, cout=256)

    u = upsample2x_bilinear(u)
    layer1 = _apply_mm(FP['layer1_1x1'], layer1, cout=64)
    u = jnp.concatenate([u, layer1], axis=-1)
    u = _apply_s1(FP['conv_up1'], u, cout=256)

    u = upsample2x_bilinear(u)
    layer0 = _apply_mm(FP['layer0_1x1'], layer0, cout=64)
    u = jnp.concatenate([u, layer0], axis=-1)
    u = _apply_s1(FP['conv_up0'], u, cout=128)

    u = upsample2x_bilinear(u)
    u = jnp.concatenate([u, x_original], axis=-1)
    u = _apply_s1(FP['conv_original_size2'], u, cout=64)

    out = _apply_mm(FP['conv_last'], u, cout=1, relu=False)
    return jnp.transpose(out, (0, 3, 1, 2)).astype(jnp.float32)  # -> NCHW


# ------------------------------- self check -----------------------------------

def _selfcheck_s1():
    """Check the fused stride-1 conv (roll-based taps) against lax.conv."""
    k1, k2 = jax.random.split(jax.random.PRNGKey(1))
    x = 0.5 * jax.random.normal(k1, (1, 16, 16, 64), jnp.float32)
    w = 0.05 * jax.random.normal(k2, (3, 3, 64, 64), jnp.float32)
    fp = _prep_s1(w, None, None)
    out = jax.jit(lambda xx: _conv_s1_fused(
        xx.astype(_ACT_DTYPE), fp['w'], fp['shift'],
        kh=3, kw=3, pad=1, cout=64, residual=None, relu=False))(x)
    ref = jax.lax.conv_general_dilated(
        x, w, window_strides=(1, 1), padding='SAME',
        dimension_numbers=('NHWC', 'HWIO', 'NHWC'))
    err = (jnp.linalg.norm(out.astype(jnp.float32) - ref)
           / (jnp.linalg.norm(ref) + 1e-6))
    assert float(err) < 0.06, f"fused conv self-check failed: rel_err={float(err)}"


# ----------------------------------- main --------------------------------------

if __name__ == "__main__":
    _selfcheck_s1()

    key = jax.random.PRNGKey(0)
    pkey, xkey = jax.random.split(key)
    params = init_params(pkey)
    fparams = jax.jit(fold_params)(params)      # BN fold + bf16 cast, done once
    fparams = jax.block_until_ready(fparams)

    # ResNet18 downsamples 32x and the decoder upsamples 2x five times,
    # so use a 64x64, 3-channel input.
    x = jax.random.normal(xkey, (1, 3, 64, 64), jnp.float32)

    fwd = jax.jit(resnet_unet_forward)
    out = jax.block_until_ready(fwd(fparams, x))

    assert out.shape == (1, 1, 64, 64), out.shape
    assert bool(jnp.all(jnp.isfinite(out)))
    print("KERNEL_OK")
</pallas_src>

<mosaic_0001>
module attributes {stable_mosaic.version = 11 : i64} {
  func.func @_conv_s1_kernel(%arg0: i32, %arg1: i32, %arg2: memref<96x192xbf16, #tpu.memory_space<vmem>>, %arg3: memref<3x192x128xbf16, #tpu.memory_space<vmem>>, %arg4: memref<1x128xf32, #tpu.memory_space<vmem>>, %arg5: memref<4x16x128xbf16, #tpu.memory_space<vmem>>) attributes {dimension_semantics = [#tpu.dimension_semantics<parallel>, #tpu.dimension_semantics<parallel>], iteration_bounds = array<i64: 4, 1>, scalar_prefetch = 0 : i64, scratch_operands = 0 : i64, tpu.core_type = #tpu.core_type<tc>, window_params = [{transform_indices = @transform_0, window_bounds = array<i64: 96, 192>}, {transform_indices = @transform_1, window_bounds = array<i64: 3, 192, 128>}, {transform_indices = @transform_2, window_bounds = array<i64: 1, 128>}, {transform_indices = @transform_3, window_bounds = array<i64: 4, 16, 128>}]} {
    %c0 = arith.constant 0 : index
    %c0_0 = arith.constant 0 : index
    %0 = vector.load %arg2[%c0, %c0_0] : memref<96x192xbf16, #tpu.memory_space<vmem>>, vector<96x192xbf16>
    %c0_1 = arith.constant 0 : index
    %c0_2 = arith.constant 0 : index
    %c0_3 = arith.constant 0 : index
    %1 = vector.load %arg3[%c0_1, %c0_2, %c0_3] : memref<3x192x128xbf16, #tpu.memory_space<vmem>>, vector<1x192x128xbf16>
    %2 = vector.shape_cast %1 : vector<1x192x128xbf16> to vector<192x128xbf16>
    %cst = arith.constant dense<0.000000e+00> : vector<96x128xf32>
    %3 = tpu.matmul %0, %2, %cst {dimension_numbers = #tpu.dot_dimension_numbers<[1], [0], [0], [1], [0, 0, 1, 1], [], []>} : vector<96x192xbf16>, vector<192x128xbf16>, vector<96x128xf32> -> vector<96x128xf32>
    %c1 = arith.constant 1 : index
    %c0_4 = arith.constant 0 : index
    %c0_5 = arith.constant 0 : index
    %4 = vector.load %arg3[%c1, %c0_4, %c0_5] : memref<3x192x128xbf16, #tpu.memory_space<vmem>>, vector<1x192x128xbf16>
    %5 = vector.shape_cast %4 : vector<1x192x128xbf16> to vector<192x128xbf16>
    %cst_6 = arith.constant dense<0.000000e+00> : vector<96x128xf32>
    %6 = tpu.matmul %0, %5, %cst_6 {dimension_numbers = #tpu.dot_dimension_numbers<[1], [0], [0], [1], [0, 0, 1, 1], [], []>} : vector<96x192xbf16>, vector<192x128xbf16>, vector<96x128xf32> -> vector<96x128xf32>
    %c95_i32 = arith.constant 95 : i32
    %7 = tpu.dynamic_rotate %6 by %c95_i32 dim 0 : vector<96x128xf32>, i32 -> vector<96x128xf32>
    %8 = arith.addf %3, %7 : vector<96x128xf32>
    %c2 = arith.constant 2 : index
    %c0_7 = arith.constant 0 : index
    %c0_8 = arith.constant 0 : index
    %9 = vector.load %arg3[%c2, %c0_7, %c0_8] : memref<3x192x128xbf16, #tpu.memory_space<vmem>>, vector<1x192x128xbf16>
    %10 = vector.shape_cast %9 : vector<1x192x128xbf16> to vector<192x128xbf16>
    %cst_9 = arith.constant dense<0.000000e+00> : vector<96x128xf32>
    %11 = tpu.matmul %0, %10, %cst_9 {dimension_numbers = #tpu.dot_dimension_numbers<[1], [0], [0], [1], [0, 0, 1, 1], [], []>} : vector<96x192xbf16>, vector<192x128xbf16>, vector<96x128xf32> -> vector<96x128xf32>
    %c94_i32 = arith.constant 94 : i32
    %12 = tpu.dynamic_rotate %11 by %c94_i32 dim 0 : vector<96x128xf32>, i32 -> vector<96x128xf32>
    %13 = arith.addf %8, %12 : vector<96x128xf32>
    %c0_10 = arith.constant 0 : index
    %c0_11 = arith.constant 0 : index
    %14 = vector.load %arg4[%c0_10, %c0_11] : memref<1x128xf32, #tpu.memory_space<vmem>>, vector<1x128xf32>
    %15 = vector.broadcast %14 : vector<1x128xf32> to vector<96x128xf32>
    %16 = arith.addf %13, %15 : vector<96x128xf32>
    %17 = vector.shape_cast %16 : vector<96x128xf32> to vector<4x24x128xf32>
    %18 = vector.extract_strided_slice %17 {offsets = [0, 0, 0], sizes = [4, 16, 128], strides = [1, 1, 1]} : vector<4x24x128xf32> to vector<4x16x128xf32>
    %19 = arith.truncf %18 : vector<4x16x128xf32> to vector<4x16x128xbf16>
    %c0_12 = arith.constant 0 : index
    %c0_13 = arith.constant 0 : index
    %c0_14 = arith.constant 0 : index
    %20 = vector.load %arg5[%c0_12, %c0_13, %c0_14] : memref<4x16x128xbf16, #tpu.memory_space<vmem>>, vector<4x16x128xbf16>
    tpu.vector_store %arg5[%c0_12, %c0_13, %c0_14], %19 {strides = array<i32>} : memref<4x16x128xbf16, #tpu.memory_space<vmem>>, vector<4x16x128xbf16>,
    return
  }
  func.func @transform_0(%arg0: i32, %arg1: i32) -> (i32, i32) {
    %c0_i32 = arith.constant 0 : i32
    %c0_i32_0 = arith.constant 0 : i32
    return %arg0, %c0_i32 : i32, i32
  }
  func.func @transform_1(%arg0: i32, %arg1: i32) -> (i32, i32, i32) {
    %c0_i32 = arith.constant 0 : i32
    %c0_i32_0 = arith.constant 0 : i32
    %c0_i32_1 = arith.constant 0 : i32
    return %c0_i32, %c0_i32_0, %arg1 : i32, i32, i32
  }
  func.func @transform_2(%arg0: i32, %arg1: i32) -> (i32, i32) {
    %c0_i32 = arith.constant 0 : i32
    %c0_i32_0 = arith.constant 0 : i32
    return %c0_i32, %arg1 : i32, i32
  }
  func.func @transform_3(%arg0: i32, %arg1: i32) -> (i32, i32, i32) {
    %c0_i32 = arith.constant 0 : i32
    %c0_i32_0 = arith.constant 0 : i32
    return %arg0, %c0_i32, %arg1 : i32, i32, i32
  }
}

</mosaic_0001>

<bundles_post_ra>
// kernel: _lambda_.1
= control target key start
LH: loop header
LB: loop body
LE: loop exit
PB: predicated region body
PF: predicated region fallthrough
CT: control target
= control target key end

     0   :  { %8 = vsyncpa [#allocation3], 0  ;;  %s1927_s0 = inlined_call_operand.vmem [shape: bf16[384,192], index: 0, kind: input, shape index: {}]   ;;  %s1928_s1 = inlined_call_operand.vmem [shape: bf16[3,192,128], index: 1, kind: input, shape index: {}]   ;;  %s1929_s2 = inlined_call_operand.vmem [shape: f32[1,128], index: 2, kind: input, shape index: {}]   ;;  %s1930_s3 = inlined_call_operand.hbm [shape: bf16[16,16,128], index: 3, kind: output, shape index: {}]  }
   0x1   :  { %10 = vsyncpa [#allocation3 + $0x1], 0  ;;  %s1535_s12 = smov 0   ;;  %s1537_s13 = smov 0  }
   0x2   :  { %s1539_s14 = smov 0   ;;  %s1541_s15 = smov 0  }
   0x3   :  { %s1543_s16 = smov 0   ;;  %s1545_s17 = smov 0  }
   0x4 LB: > { %s1019_s18 = sadd.s32 4294967295, %s1511_s17   ;;  %s1020_s19 = sadd.s32 4294967294, %s1511_s17   ;;  %s1511_s17 = sphi %s1545_s17, %s16_s17   ;;  %s1507_s16 = sphi %s1543_s16, %s1937_s16   ;;  %s1503_s15 = sphi %s1541_s15, %s1936_s15   ;;  %s1499_s14 = sphi %s1539_s14, %s1935_s14   ;;  %s1495_s13 = sphi %s1537_s13, %s1934_s13   ;;  %s1491_s12 = sphi %s1535_s12, %s1933_s12  }
   0x5   : > { %s28_s20 = sadd.s32 1, %s1507_s16  ;;  %s115_s21 = sadd.s32 1, %s1499_s14 }
   0x6   : > { %p30_p0 = scmp.ge.s32.totalorder %s28_s20, 4  ;;  %p125_p1 = scmp.ne.s32.totalorder %s1499_s14, %s1495_s13 }
   0x7   : > { %p126_p2 = scmp.eq.s32.totalorder %s1019_s18, 3  ;;  %p131_p3 = scmp.ne.s32.totalorder %s1495_s13, %s1491_s12 }
   0x8   : > { %s1939_s20 = smov (%p30_p0, %s28_s20), 0  ;;  %p132_p5 = scmp.eq.s32.totalorder %s1020_s19, 3 }
   0x9   : > { %p1575_p4 = por %p126_p2, %p125_p1  ;;  %s110_s23 = ssub.s32 %s1507_s16, %s1939_s20 }
   0xa   : > { %p1025_p6 = scmp.ge.s32.totalorder %s1511_s17, 1  ;;  %p113_p7 = scmp.eq.s32.totalorder %s110_s23, 0 }
   0xb   : > { %p1582_p8 = por %p132_p5, %p131_p3  ;;  %p173_p9 = scmp.lt.s32.totalorder %s1511_s17, 5 }
   0xc   : > { %s1588_s25 = scalar_select %p113_p7, %s1499_s14, %s115_s21  }
   0xd   : > { %p174_p10 = pnand %p1025_p6, %p173_p9 }
   0xe   : > { %s205_s5 = smul.u32 (!%p174_p10), 12, %s1503_s15  ;;  %s1343_s23 = sshll.u32 (!%p174_p10), %s1503_s15, 5 }
   0xf   : > { %177 = sbr.rel (%p174_p10) target bundleno = 337 (0x151), region = 32  ;;  %s916_s28 = scalar_lea.hbm (!%p174_p10), %s1930_s3, %s1343_s23 }
  0x10   : > { %p206_p11 = scmp.lt.s32.totalorder (!%p174_p10), %s205_s5, 47  ;;  %s919_s15 = sshll.u32 (!%p174_p10), %s916_s28, 4  ;;  %s920_s15 = int_to_ptr.hbm [resolvable:$true] %s919_s15 }
  0x11   : > { %s1447_s4 = sshra.s32 (!%p174_p10), %s920_s15, 4  ;;  %s1453_s9 = scalar_lea.hbm (!%p174_p10), %s1930_s3, 128  ;;  %s1448_s4 = int_to_ptr.hbm [resolvable:$true] %s1447_s4 }
  0x12   : > { %s1449_s6 = scalar_lea.hbm (!%p174_p10), %s1448_s4, 32  ;;  %p1454_p1 = scmp.lt.s32.totalorder (!%p174_p10), %s1448_s4, %s1930_s3 }
  0x13   : > { %p1450_p12 = scmp.ne.s32.totalorder (!%p174_p10), %s1448_s4, %s1449_s6  ;;  %p1455_p2 = scmp.lt.s32.totalorder (!%p174_p10), %s1453_s9, %s1449_s6 }
  0x14   : > { %v1325_v0 = vld [vmem:[%s1928_s1 + $0x98] sm:$0xff]  ;;  %v1324_v4 = vld [vmem:[%s1928_s1 + $0x90] sm:$0xff]  ;;  %s1941_s5 = smov (!%p206_p11, %s205_s5), 47  ;;  %v1323_v8 = vld [vmem:[%s1928_s1 + $0x88] sm:$0xff]  ;;  %vm408_vm0 = vcmask 523264  }
  0x15   : > { %v1596_v1 = vld [vmem:[%s1928_s1 + $0xb8] sm:$0xff]  ;;  %427 = vmatpush.bf16.msra.mxu0 %v1325_v0  ;;  %v1614_v5 = vld [vmem:[%s1928_s1 + $0xb0] sm:$0xff]  ;;  %v1632_v9 = vld [vmem:[%s1928_s1 + $0xa8] sm:$0xff]  ;;  %s1293_s30 = sshll.u32 %s1941_s5, 3  ;;  %p1451_p13 = pnand %p1450_p12, %p1575_p4 }
  0x16   : > { %v1601_v2 = vld [vmem:[%s1928_s1 + $0x58] sm:$0xff]  ;;  %1367 = vmatpush.bf16.msra.mxu1 %v1596_v1  ;;  %v1620_v6 = vld [vmem:[%s1928_s1 + $0x50] sm:$0xff]  ;;  %v1638_v10 = vld [vmem:[%s1928_s1 + $0x48] sm:$0xff]  ;;  %s1646_s11 = scalar_lea.vmem %s1927_s0, %s1293_s30  ;;  %p1456_p3 = por %p1455_p2, %p1454_p1 }
  0x17   : > { %v1313_v3 = vld [vmem:[%s1928_s1 + $0x38] sm:$0xff]  ;;  %1371 = vmatpush.bf16.msra.mxu3 %v1601_v2  ;;  %v1312_v7 = vld [vmem:[%s1928_s1 + $0x30] sm:$0xff]  ;;  %v1311_v11 = vld [vmem:[%s1928_s1 + $0x28] sm:$0xff]  ;;  %p1452_p0 = pneg %p1451_p13 }
  0x18   : > { %600 = vmatpush.bf16.msra.mxu2 %v1313_v3  ;;  %v1322_v12 = vld [vmem:[%s1928_s1 + $0x80] sm:$0xff]  ;;  %v1073_v15 = vld [vmem:[%s1646_s11 + $0x28] sm:$0xf0]  ;;  %v1341_v18 = vld [vmem:[%s1928_s1 + $0x118] sm:$0xff] }
  0x19   : > { %428 = vmatpush.bf16.msra.mxu0 %v1324_v4  ;;  %v1655_v13 = vld [vmem:[%s1928_s1 + $0xa0] sm:$0xff]  ;;  %v1337_v19 = vld [vmem:[%s1928_s1 + $0xf8] sm:$0xff]  ;;  %v1336_v23 = vld [vmem:[%s1928_s1 + $0xf0] sm:$0xff]  ;;  %p1457_p5 = pnand %p1456_p3, %p1452_p0 }
  0x1a   : > { %1368 = vmatpush.bf16.msra.mxu1 %v1614_v5  ;;  %v1298_v14 = vld [vmem:[%s1646_s11 + $0x24] sm:$0xf]  ;;  %v1321_v21 = vld [vmem:[%s1928_s1 + $0x78] sm:$0xff]  ;;  %v1340_v24 = vld [vmem:[%s1928_s1 + $0x110] sm:$0xff] }
  0x1b   : > { %1372 = vmatpush.bf16.msra.mxu3 %v1620_v6  ;;  %v1663_v16 = vld [vmem:[%s1928_s1 + $0x40] sm:$0xff]  ;;  %v1674_v20 = vor.u32 %v1298_v14, %v1073_v15  ;;  %v1309_v22 = vld [vmem:[%s1928_s1 + $0x18] sm:$0xff]  ;;  %v1320_v25 = vld [vmem:[%s1928_s1 + $0x70] sm:$0xff] }
  0x1c   : > { %601 = vmatpush.bf16.msra.mxu2 %v1312_v7  ;;  %v1310_v17 = vld [vmem:[%s1928_s1 + $0x20] sm:$0xff]  ;;  %v1308_v26 = vld [vmem:[%s1928_s1 + $0x10] sm:$0xff]  ;;  %v1335_v27 = vld [vmem:[%s1928_s1 + $0xe8] sm:$0xff] }
  0x1d   : > { %429 = vmatpush.bf16.msra.mxu0 %v1323_v8  ;;  %v1339_v28 = vld [vmem:[%s1928_s1 + $0x108] sm:$0xff]  ;;  %v1334_v31 = vld [vmem:[%s1928_s1 + $0xe0] sm:$0xff]  ;;  %v1300_v35 = vld [vmem:[%s1646_s11 + $0x34] sm:$0xf] }
  0x1e   : > { %1369 = vmatpush.bf16.msra.mxu1 %v1632_v9  ;;  %v1319_v29 = vld [vmem:[%s1928_s1 + $0x68] sm:$0xff]  ;;  %v1318_v32 = vld [vmem:[%s1928_s1 + $0x60] sm:$0xff]  ;;  %v1081_v36 = vld [vmem:[%s1646_s11 + $0x38] sm:$0xf0] }
  0x1f   : > { %1373 = vmatpush.bf16.msra.mxu3 %v1638_v10  ;;  %v1307_v30 = vld [vmem:[%s1928_s1 + $0x8] sm:$0xff]  ;;  %v1055_v33 = vld [vmem:[%s1646_s11] sm:$0xf]  ;;  %v1333_v38 = vld [vmem:[%s1928_s1 + $0xd8] sm:$0xff]  ;;  %v1728_v40 = vor.u32 %v1300_v35, %v1081_v36 }
  0x20   : > { %602 = vmatpush.bf16.msra.mxu2 %v1311_v11  ;;  %v1295_v34 = vld [vmem:[%s1646_s11 + $0x4] sm:$0xf0]  ;;  %v1306_v37 = vld [vmem:[%s1928_s1] sm:$0xff]  ;;  %v1332_v41 = vld [vmem:[%s1928_s1 + $0xd0] sm:$0xff] }
  0x21   : > { %430 = vmatpush.bf16.msra.mxu0 %v1322_v12  ;;  %v1056_v39 = vor.u32 %v1295_v34, %v1055_v33  ;;  %v1338_v42 = vld [vmem:[%s1928_s1 + $0x100] sm:$0xff]  ;;  %v1331_v43 = vld [vmem:[%s1928_s1 + $0xc8] sm:$0xff]  ;;  %v1063_v45 = vld [vmem:[%s1646_s11 + $0x10] sm:$0xf] }
  0x22   : > { %1370 = vmatpush.bf16.msra.mxu1 %v1655_v13  ;;  %v1330_v44 = vld [vmem:[%s1928_s1 + $0xc0] sm:$0xff]  ;;  %v1297_v46 = vld [vmem:[%s1646_s11 + $0x14] sm:$0xf0]  ;;  %v1089_v48 = vld [vmem:[%s1646_s11 + $0x48] sm:$0xf0] }
  0x23   : > { %1374 = vmatpush.bf16.msra.mxu3 %v1663_v16  ;;  %v1302_v47 = vld [vmem:[%s1646_s11 + $0x44] sm:$0xf]  ;;  %v1064_v49 = vor.u32 %v1297_v46, %v1063_v45  ;;  %v1071_v51 = vld [vmem:[%s1646_s11 + $0x20] sm:$0xf]  ;;  %v1299_v52 = vld [vmem:[%s1646_s11 + $0x24] sm:$0xf0] }
  0x24   : > { %603 = vmatpush.bf16.msra.mxu2 %v1310_v17  ;;  %v1092_v50 = vor.u32 %v1302_v47, %v1089_v48  ;;  %v1304_v53 = vld [vmem:[%s1646_s11 + $0x54] sm:$0xf]  ;;  %v1097_v54 = vld [vmem:[%s1646_s11 + $0x58] sm:$0xf0]  ;;  %v1072_v55 = vor.u32 %v1299_v52, %v1071_v51  ;;  %v1079_v57 = vld [vmem:[%s1646_s11 + $0x30] sm:$0xf] }
  0x25   : > { %1151 = vmatmul.msk.bf16.vlgmr.msra.gmra.mxu1 %vm408_vm0, %v1674_v20  ;;  %431 = vmatpush.bf16.msra.mxu0 %v1321_v21  ;;  %v1100_v56 = vor.u32 %v1304_v53, %v1097_v54  ;;  %v1301_v58 = vld [vmem:[%s1646_s11 + $0x34] sm:$0xf0]  ;;  %v1294_v59 = vld [vmem:[%s1646_s11 + $0x4] sm:$0xf]  ;;  %v1057_v60 = vld [vmem:[%s1646_s11 + $0x8] sm:$0xf0] }
  0x26   : > { %767 = vmatpush.bf16.msrb.mxu1 %v1337_v19  ;;  %1205 = vmatmul.msk.bf16.vlgmr.msra.gmra.mxu3 %vm408_vm0, %v1674_v20  ;;  %v1080_v61 = vor.u32 %v1301_v58, %v1079_v57  ;;  %v1060_v62 = vor.u32 %v1294_v59, %v1057_v60  ;;  %v1087_v63 = vld [vmem:[%s1646_s11 + $0x40] sm:$0xf]  ;;  %v1303_v0 = vld [vmem:[%s1646_s11 + $0x44] sm:$0xf0] }
  0x27   : > { %810 = vmatpush.bf16.msrb.mxu3 %v1341_v18  ;;  %v1088_v3 = vor.u32 %v1303_v0, %v1087_v63 }
  0x28   : > { %604 = vmatpush.bf16.msra.mxu2 %v1309_v22 }
  0x29   : > { %432 = vmatpush.bf16.msra.mxu0 %v1320_v25 }
  0x2a   : > { %768 = vmatpush.bf16.msrb.mxu1 %v1336_v23 }
  0x2b   : > { %811 = vmatpush.bf16.msrb.mxu3 %v1340_v24 }
  0x2c   : > { %605 = vmatpush.bf16.msra.mxu2 %v1308_v26 }
  0x2d   : > { %433 = vmatpush.bf16.msra.mxu0 %v1319_v29 }
  0x2e   : > { %769 = vmatpush.bf16.msrb.mxu1 %v1335_v27 }
  0x2f   : > { %812 = vmatpush.bf16.msrb.mxu3 %v1339_v28 }
  0x30   : > { %606 = vmatpush.bf16.msra.mxu2 %v1307_v30 }
  0x31   : > { %434 = vmatpush.bf16.msra.mxu0 %v1318_v32 }
  0x32   : > { %770 = vmatpush.bf16.msrb.mxu1 %v1334_v31  ;;  %v517_v31 = vlaneseq }
  0x33   : > { %813 = vmatpush.bf16.msrb.mxu3 %v1338_v42 }
  0x34   : > { %607 = vmatpush.bf16.msra.mxu2 %v1306_v37  ;;  %435 = vmatmul.bf16.vlgmr.msra.gmra.mxu0 %v1056_v39  ;;  %v1804_v32 = vshrl.u32 %v517_v31, 7 }
  0x35   : > { %470 = vmatpush.bf16.msrb.mxu0 %v1596_v1  ;;  %1152 = vmatmul.msk.bf16.gmra.mxu1 %vm408_vm0, %v1728_v40  ;;  %v1296_v1 = vld [vmem:[%s1646_s11 + $0x14] sm:$0xf] }
  0x36   : > { %771 = vmatpush.bf16.msrb.mxu1 %v1333_v38  ;;  %1206 = vmatmul.msk.bf16.gmra.mxu3 %vm408_vm0, %v1728_v40  ;;  %vm519_vm1 = vcmp.lt.s32.totalorder %v1804_v32, 7  ;;  %vm857_vm2 = vcmp.lt.s32.totalorder %v1804_v32, 6 }
  0x37   : > { %608 = vmatmul.bf16.vlgmr.msra.gmra.mxu2 %v1056_v39 }
  0x38   : > { %639 = vmatpush.bf16.msrb.mxu2 %v1601_v2  ;;  %v1065_v2 = vld [vmem:[%s1646_s11 + $0x18] sm:$0xf0] }
  0x39   : > { %471 = vmatpush.bf16.msrb.mxu0 %v1614_v5  ;;  %v1068_v4 = vor.u32 %v1296_v1, %v1065_v2  ;;  %v1095_v5 = vld [vmem:[%s1646_s11 + $0x50] sm:$0xf] }
  0x3a   : > { %772 = vmatpush.bf16.msrb.mxu1 %v1332_v41 }
  0x3c   : > { %640 = vmatpush.bf16.msrb.mxu2 %v1620_v6  ;;  %v1305_v6 = vld [vmem:[%s1646_s11 + $0x54] sm:$0xf0]  ;;  %s202_s11 = sand.u32 1, %s1495_s13  }
  0x3d   : > { %472 = vmatpush.bf16.msrb.mxu0 %v1632_v9  ;;  %v1096_v7 = vor.u32 %v1305_v6, %v1095_v5  ;;  %s1026_s5 = sshll.u32 %s202_s11, 5  ;;  %s903_s30 = scalar_lea.sflag [#allocation3], %s202_s11 }
  0x3e   : > { %773 = vmatpush.bf16.msrb.mxu1 %v1331_v43  ;;  %s1874_s21 = scalar_lea.vmem [#allocation2], %s1026_s5 }
  0x3f   : > { %s917_s29 = sshll.u32 %s1874_s21, 4  ;;  %s918_s29 = int_to_ptr.vmem [resolvable:$true] %s917_s29 }
  0x40   : > { %641 = vmatpush.bf16.msrb.mxu2 %v1638_v10 }
  0x41   : > { %473 = vmatpush.bf16.msrb.mxu0 %v1655_v13 }
  0x42   : > { %774 = vmatpush.bf16.msrb.mxu1 %v1330_v44 }
  0x44   : > { %642 = vmatpush.bf16.msrb.mxu2 %v1663_v16  ;;  %440 = vmatmul.bf16.gmra.mxu0 %v1064_v49 }
  0x45   : > { %1153 = vmatmul.msk.bf16.gmra.mxu1 %vm408_vm0, %v1092_v50 }
  0x46   : > { %1207 = vmatmul.msk.bf16.gmra.mxu3 %vm408_vm0, %v1092_v50 }
  0x47   : > { %613 = vmatmul.bf16.gmra.mxu2 %v1064_v49 }
  0x54   : > { %445 = vmatmul.bf16.gmra.mxu0 %v1072_v55 }
  0x55   : > { %1154 = vmatmul.msk.bf16.gmra.mxu1 %vm408_vm0, %v1100_v56 }
  0x56   : > { %1208 = vmatmul.msk.bf16.gmra.mxu3 %vm408_vm0, %v1100_v56 }
  0x57   : > { %617 = vmatmul.bf16.gmra.mxu2 %v1072_v55 }
  0x64   : > { %450 = vmatmul.bf16.gmra.mxu0 %v1080_v61 }
  0x65   : > { %775 = vmatmul.bf16.vlgmr.msrb.gmra.mxu1 %v1056_v39 }
  0x66   : > { %1281 = vmatmul.msk.bf16.vlgmr.msrb.gmra.mxu3 %vm408_vm0, %v1060_v62 }
  0x67   : > { %621 = vmatmul.bf16.gmra.mxu2 %v1080_v61 }
  0x74   : > { %455 = vmatmul.bf16.gmra.mxu0 %v1088_v3 }
  0x75   : > { %780 = vmatmul.bf16.gmra.mxu1 %v1064_v49 }
  0x76   : > { %1282 = vmatmul.msk.bf16.gmra.mxu3 %vm408_vm0, %v1068_v4 }
  0x77   : > { %626 = vmatmul.bf16.gmra.mxu2 %v1088_v3 }
  0x84   : > { %460 = vmatmul.bf16.gmra.mxu0 %v1096_v7 }
  0x85   : > { %785 = vmatmul.bf16.gmra.mxu1 %v1072_v55 }
  0x86   : > { %1283 = vmatmul.msk.bf16.gmra.mxu3 %vm408_vm0, %v1674_v20 }
  0x87   : > { %630 = vmatmul.bf16.gmra.mxu2 %v1096_v7 }
  0x94   : > { %1149 = vmatmul.msk.bf16.vlgmr.msrb.gmra.mxu0 %vm408_vm0, %v1060_v62 }
  0x95   : > { %790 = vmatmul.bf16.gmra.mxu1 %v1080_v61 }
  0x96   : > { %1284 = vmatmul.msk.bf16.gmra.mxu3 %vm408_vm0, %v1728_v40 }
  0x97   : > { %1203 = vmatmul.msk.bf16.vlgmr.msrb.gmra.mxu2 %vm408_vm0, %v1060_v62 }
  0xa2   : > { %v485_v8 = vpop.f32.mrf.mxu1 }
  0xa4   : > { %1150 = vmatmul.msk.bf16.gmra.mxu0 %vm408_vm0, %v1068_v4 }
  0xa5   : > { %795 = vmatmul.bf16.gmra.mxu1 %v1088_v3 }
  0xa6   : > { %1285 = vmatmul.msk.bf16.gmra.mxu3 %vm408_vm0, %v1092_v50 }
  0xa7   : > { %1204 = vmatmul.msk.bf16.gmra.mxu2 %vm408_vm0, %v1068_v4 }
  0xa9   : > { %v653_v9 = vpop.f32.mrf.mxu3 }
  0xaa   : > { %v487_v10 = vpop.f32.mrf.mxu1 }
  0xb1   : > { %v655_v11 = vpop.f32.mrf.mxu3  ;;  %v1787_v12 = vpop.f32.mrf.mxu0 }
  0xb2   : > { %v490_v13 = vpop.f32.mrf.mxu1 }
  0xb5   : > { %800 = vmatmul.bf16.gmra.mxu1 %v1096_v7 }
  0xb6   : > { %1286 = vmatmul.msk.bf16.gmra.mxu3 %vm408_vm0, %v1100_v56 }
  0xb9   : > { %v657_v14 = vpop.f32.mrf.mxu3  ;;  %v1792_v16 = vpop.f32.mrf.mxu0 }
  0xba   : > { %v1790_v15 = vpop.f32.mrf.mxu2  ;;  %v492_v17 = vpop.f32.mrf.mxu1 }
  0xc1   : > { %v659_v18 = vpop.f32.mrf.mxu3  ;;  %v1796_v20 = vpop.f32.mrf.mxu0 }
  0xc2   : > { %v1794_v19 = vpop.f32.mrf.mxu2  ;;  %v495_v21 = vpop.f32.mrf.mxu1 }
  0xc9   : > { %v662_v22 = vpop.f32.mrf.mxu3  ;;  %v1798_v24 = vpop.f32.mrf.mxu0 }
  0xca   : > { %v614_v23 = vpop.f32.mrf.mxu2  ;;  %v497_v25 = vpop.f32.mrf.mxu1 }
  0xd1   : > { %v663_v26 = vpop.f32.mrf.mxu3  ;;  %v446_v28 = vpop.f32.mrf.mxu0 }
  0xd2   : > { %v1800_v27 = vpop.f32.mrf.mxu2  ;;  %v500_v29 = vpop.f32.mrf.mxu1  ;;  %v1802_v30 = vadd.f32 %v485_v8, %v446_v28 }
  0xd4   : > { %v509_v38 = vrot.slane %v1802_v30, 1 }
  0xd9   : > { %v666_v33 = vpop.f32.mrf.mxu3  ;;  %v448_v35 = vpop.f32.mrf.mxu0 }
  0xda   : > { %v618_v34 = vpop.f32.mrf.mxu2  ;;  %v502_v36 = vpop.f32.mrf.mxu1  ;;  %v488_v37 = vadd.f32 %v487_v10, %v448_v35 }
  0xdc   : > { %v510_v39 = vrot.slane %v488_v37, 1 }
  0xde   : > { %v524_v40 = vsel %vm519_vm1, %v509_v38, %v510_v39 }
  0xdf   : > { %v619_v41 = vadd.f32 %v618_v34, %v524_v40 }
  0xe1   : > { %v668_v42 = vpop.f32.mrf.mxu3  ;;  %v451_v44 = vpop.f32.mrf.mxu0  ;;  %v1814_v46 = vadd.f32 %v653_v9, %v619_v41 }
  0xe2   : > { %v620_v43 = vpop.f32.mrf.mxu2  ;;  %v1812_v45 = vpop.f32.mrf.mxu1  ;;  %v491_v47 = vadd.f32 %v490_v13, %v451_v44 }
  0xe4   : > { %v511_v53 = vrot.slane %v491_v47, 1 }
  0xe9   : > { %v815_v48 = vpop.f32.mrf.mxu3  ;;  %v453_v50 = vpop.f32.mrf.mxu0 }
  0xea   : > { %v622_v49 = vpop.f32.mrf.mxu2  ;;  %v778_v51 = vpop.f32.mrf.mxu1  ;;  %v493_v52 = vadd.f32 %v492_v17, %v453_v50 }
  0xec   : > { %v512_v54 = vrot.slane %v493_v52, 1 }
  0xee   : > { %v523_v55 = vsel %vm519_vm1, %v511_v53, %v512_v54 }
  0xef   : > { %v623_v56 = vadd.f32 %v622_v49, %v523_v55 }
  0xf1   : > { %v817_v57 = vpop.f32.mrf.mxu3  ;;  %v456_v59 = vpop.f32.mrf.mxu0  ;;  %v1818_v61 = vadd.f32 %v657_v14, %v623_v56 }
  0xf2   : > { %v624_v58 = vpop.f32.mrf.mxu2  ;;  %v781_v60 = vpop.f32.mrf.mxu1  ;;  %v496_v62 = vadd.f32 %v495_v21, %v456_v59  ;;  %v818_v55 = vadd.f32 %v817_v57, %v778_v51 }
  0xf4   : > { %v513_v63 = vrot.slane %v496_v62, 1 }
  0xf6   : > { %v522_v0 = vsel %vm519_vm1, %v512_v54, %v513_v63 }
  0xf7   : > { %v625_v1 = vadd.f32 %v624_v58, %v522_v0 }
  0xf9   : > { %v820_v2 = vpop.f32.mrf.mxu3  ;;  %v458_v4 = vpop.f32.mrf.mxu0  ;;  %v1824_v6 = vadd.f32 %v659_v18, %v625_v1 }
  0xfa   : > { %v627_v3 = vpop.f32.mrf.mxu2  ;;  %v1822_v5 = vpop.f32.mrf.mxu1  ;;  %v498_v7 = vadd.f32 %v497_v25, %v458_v4  ;;  %v821_v63 = vadd.f32 %v820_v2, %v781_v60 }
  0xfb   : > { %v846_v3 = vrot.slane %v818_v55, 2 }
  0xfc   : > { %v514_v14 = vrot.slane %v498_v7, 1 }
 0x101   : > { %v1826_v8 = vpop.f32.mrf.mxu3  ;;  %v461_v10 = vpop.f32.mrf.mxu0 }
 0x102   : > { %v628_v9 = vpop.f32.mrf.mxu2  ;;  %v786_v11 = vpop.f32.mrf.mxu1  ;;  %v501_v13 = vadd.f32 %v500_v29, %v461_v10 }
 0x104   : > { %v515_v17 = vrot.slane %v501_v13, 1 }
 0x106   : > { %v521_v21 = vsel %vm519_vm1, %v514_v14, %v515_v17 }
 0x107   : > { %v629_v22 = vadd.f32 %v628_v9, %v521_v21  ;;  %v847_v9 = vrot.slane %v821_v63, 2 }
 0x109   : > { %v825_v23 = vpop.f32.mrf.mxu3  ;;  %v463_v31 = vpop.f32.mrf.mxu0  ;;  %v1830_v35 = vadd.f32 %v663_v26, %v629_v22 }
 0x10a   : > { %v631_v28 = vpop.f32.mrf.mxu2  ;;  %v788_v34 = vpop.f32.mrf.mxu1  ;;  %v503_v18 = vadd.f32 %v502_v36, %v463_v31  ;;  %v864_v31 = vsel %vm857_vm2, %v846_v3, %v847_v9 }
 0x10c   : > { %v516_v25 = vrot.slane %v503_v18, 1 }
 0x10e   : > { %v520_v37 = vsel %vm519_vm1, %v515_v17, %v516_v25  ;;  %v823_v25 = vadd.f32 %v1826_v8, %v1822_v5 }
 0x10f   : > { %v632_v39 = vadd.f32 %v631_v28, %v520_v37 }
 0x111   : > { %v827_v40 = vpop.f32.mrf.mxu3  ;;  %v475_v41 = vpop.f32.mrf.mxu0  ;;  %v1834_v43 = vadd.f32 %v666_v33, %v632_v39 }
 0x112   : > { %v633_v29 = vpop.f32.mrf.mxu2  ;;  %v791_v42 = vpop.f32.mrf.mxu1  ;;  %v476_v44 = vadd.f32 %v475_v41, %v1787_v12  ;;  %v816_v12 = vadd.f32 %v815_v48, %v1812_v45  ;;  %v828_v10 = vadd.f32 %v827_v40, %v788_v34  ;;  %v826_v48 = vadd.f32 %v825_v23, %v786_v11  ;;  %v1432_v11 = vld [vmem:[%s1929_s2] ss:$0 sm:$0xff] }
 0x114   : > { %v505_v36 = vrot.slane %v476_v44, 1  ;;  %v845_v57 = vrot.slane %v816_v12, 2  ;;  %v850_v34 = vrot.slane %v828_v10, 2  ;;  %v849_v37 = vrot.slane %v826_v48, 2 }
 0x116   : > { %v862_v44 = vsel %vm857_vm2, %v849_v37, %v850_v34 }
 0x119   : > { %v830_v47 = vpop.f32.mrf.mxu3  ;;  %v477_v50 = vpop.f32.mrf.mxu0 }
 0x11a   : > { %v644_v49 = vpop.f32.mrf.mxu2  ;;  %v793_v52 = vpop.f32.mrf.mxu1  ;;  %v478_v26 = vadd.f32 %v477_v50, %v1792_v16  ;;  %v831_v16 = vadd.f32 %v830_v47, %v791_v42 }
 0x11c   : > { %v506_v53 = vrot.slane %v478_v26, 1  ;;  %v851_v13 = vrot.slane %v831_v16, 2 }
 0x11e   : > { %v527_v54 = vsel %vm519_vm1, %v505_v36, %v506_v53 }
 0x11f   : > { %v610_v59 = vadd.f32 %v1790_v15, %v527_v54 }
 0x121   : > { %v832_v56 = vpop.f32.mrf.mxu3  ;;  %v480_v62 = vpop.f32.mrf.mxu0  ;;  %v645_v7 = vadd.f32 %v644_v49, %v610_v59  ;;  %v848_v49 = vrot.slane %v823_v25, 2 }
 0x122   : > { %v646_v58 = vpop.f32.mrf.mxu2  ;;  %v833_v33 = vadd.f32 %v832_v56, %v793_v52  ;;  %v481_v0 = vadd.f32 %v480_v62, %v1796_v20  ;;  %v796_v1 = vpop.f32.mrf.mxu1  ;;  %v865_v20 = vsel %vm857_vm2, %v845_v57, %v846_v3 }
 0x123   : > { %v866_v14 = vadd.f32 %v865_v20, %v645_v7 }
 0x124   : > { %v507_v4 = vrot.slane %v481_v0, 1  ;;  %v852_v51 = vrot.slane %v833_v33, 2 }
 0x125   : > { %v878_v41 = vadd.f32 %v1432_v11, %v866_v14 }
 0x126   : > { %v526_v15 = vsel %vm519_vm1, %v506_v53, %v507_v4  ;;  %v861_v17 = vsel %vm857_vm2, %v851_v13, %v852_v51  ;;  %v869_v53 = vadd.f32 %v862_v44, %v1814_v46 }
 0x127   : > { %v612_v45 = vadd.f32 %v1794_v19, %v526_v15  ;;  %v870_v39 = vadd.f32 %v861_v17, %v1818_v61 }
 0x128   : > { %v881_v55 = vadd.f32 %v1432_v11, %v869_v53 }
 0x129   : > { %v835_v60 = vpop.f32.mrf.mxu3  ;;  %v647_v21 = vadd.f32 %v646_v58, %v612_v45  ;;  %v482_v28 = vpop.f32.mrf.mxu0  ;;  %v882_v50 = vadd.f32 %v1432_v11, %v870_v39 }
 0x12a   : > { %v649_v2 = vpop.f32.mrf.mxu2  ;;  %v836_v22 = vadd.f32 %v835_v60, %v796_v1  ;;  %v483_v19 = vadd.f32 %v482_v28, %v1798_v24  ;;  %v798_v29 = vpop.f32.mrf.mxu1 }
 0x12b   : > { %v867_v23 = vadd.f32 %v864_v31, %v647_v21 }
 0x12c   : > { %v853_v18 = vrot.slane %v836_v22, 2  ;;  %v508_v40 = vrot.slane %v483_v19, 1 }
 0x12d   : > { %v879_v42 = vadd.f32 %v1432_v11, %v867_v23 }
 0x12e   : > { %v860_v24 = vsel %vm857_vm2, %v852_v51, %v853_v18  ;;  %v525_v5 = vsel %vm519_vm1, %v508_v40, %v509_v38  ;;  %v863_v38 = vsel %vm857_vm2, %v848_v49, %v849_v37 }
 0x12f   : > { %v871_v47 = vadd.f32 %v860_v24, %v1824_v6  ;;  %v1347_v8 = vpack.c.bf16 %v879_v42, %v878_v41  ;;  %v616_v61 = vadd.f32 %v1800_v27, %v525_v5 }
 0x131   : > { %v883_v52 = vadd.f32 %v1432_v11, %v871_v47  ;;  %v837_v26 = vpop.f32.mrf.mxu3  ;;  %1348 = vst [vmem:[%s1874_s21] sm:$0xff] %v1347_v8  }
 0x132   : > { %v650_v36 = vpop.f32.mrf.mxu2  ;;  %v801_v56 = vpop.f32.mrf.mxu1  ;;  %v838_v33 = vadd.f32 %v837_v26, %v798_v29 }
 0x133   : > { %v651_v30 = vadd.f32 %v650_v36, %v616_v61  ;;  %v1357_v6 = vpack.c.bf16 %v883_v52, %v882_v50 }
 0x134   : > { %v854_v12 = vrot.slane %v838_v33, 2 }
 0x135   : > { %v868_v27 = vadd.f32 %v863_v38, %v651_v30  ;;  %1365 = vst [vmem:[%s1874_s21 + $0x10] sm:$0xff] %v1357_v6  }
 0x137   : > { %v880_v54 = vadd.f32 %v1432_v11, %v868_v27 }
 0x139   : > { %v1352_v58 = vpack.c.bf16 %v881_v55, %v880_v54  ;;  %v840_v59 = vpop.f32.mrf.mxu3 }
 0x13a   : > { %v841_v46 = vadd.f32 %v840_v59, %v801_v56  ;;  %v803_v63 = vpop.f32.mrf.mxu1 }
 0x13b   : > { %1364 = vst [vmem:[%s1874_s21 + $0x8] sm:$0xff] %v1352_v58  }
 0x13c   : > { %v855_v62 = vrot.slane %v841_v46, 2 }
 0x13e   : > { %v859_v1 = vsel %vm857_vm2, %v854_v12, %v855_v62 }
 0x13f   : > { %v872_v4 = vadd.f32 %v859_v1, %v1830_v35 }
 0x141   : > { %v842_v0 = vpop.f32.mrf.mxu3  ;;  %v884_v57 = vadd.f32 %v1432_v11, %v872_v4 }
 0x142   : > { %v843_v16 = vadd.f32 %v842_v0, %v803_v63 }
 0x144   : > { %v856_v3 = vrot.slane %v843_v16, 2 }
 0x146   : > { %v858_v7 = vsel %vm857_vm2, %v855_v62, %v856_v3 }
 0x147   : > { %v873_v51 = vadd.f32 %v858_v7, %v1834_v43 }
 0x149   : > { %v885_v9 = vadd.f32 %v1432_v11, %v873_v51 }
 0x14b   : > { %v1362_v10 = vpack.c.bf16 %v885_v9, %v884_v57 }
 0x14d   : > { %1366 = vst [vmem:[%s1874_s21 + $0x18] sm:$0xff] %v1362_v10  }
 0x14e   : > { %1460 = shalt.err (!%p1457_p5)
}
 0x14f   : > { %s1513_s11 = smov 64   ;;  %s1514_s19 = smov 4  }
 0x150   : > { %1375 = dma.vmem_to_hbm [thread:$0]  (%p1575_p4), %s918_s29, 512, %s920_s15, %s903_s30, %s1513_s11, %s1513_s11, %s1514_s19  }
 0x151 PF: > { %p1381_p6 = scmp.ge.s32.totalorder %s1511_s17, 2  ;;  %s934_s5 = sand.u32 1, %s1491_s12  }
 0x152   : > { %s935_s21 = scalar_lea.sflag [#allocation3], %s934_s5 }
 0x153   : > { %p1378_p7 = pnand %p1381_p6, %p1582_p8 }
 0x155   : > { %p1379_p9 = pneg %p1378_p7 }
 0x157   : > { %1486 = dma.done.wait (%p1379_p9), %s935_s21, 512  }
 0x158   : > { %1488 = vsyncadd (%p1379_p9), %s935_s21, 4294966784  ;;  %s16_s17 = sadd.s32 1, %s1511_s17   ;;  %s1933_s12 = smov %s1495_s13 }
 0x159   : > { %p13_p10 = scmp.ge.s32.totalorder %s16_s17, 6   ;;  %s1934_s13 = smov %s1499_s14 }
 0x15a   : > { %s1935_s14 = smov %s1588_s25  ;;  %s1936_s15 = smov %s1507_s16 }
 0x15b   : > { %s1937_s16 = smov %s1939_s20  ;;  %15 = sbr.rel (!%p13_p10) target bundleno = 4 (0x4), region = 75 }
 0x160   :  { %941 = vsyncpa [#allocation3], 1 }
 0x161   :  { %943 = vsyncpa [#allocation3 + $0x1], 1 }

</bundles_post_ra>
